<compile_context>
chip_gen: v7x
topology: tpu7x:2x2x1
jax: 0.10.0
libtpu: 0.0.40
codegen_flags: <defaults>
</compile_context>

<pallas_src>
import numpy as np
import jax
import jax.numpy as jnp
from jax import lax
from jax.experimental import pallas as pl
from jax.experimental.pallas import tpu as pltpu


def _round_up(x, m):
    return ((int(x) + m - 1) // m) * m


# ----------------------------------------------------------------------------
# Kernels (time-major: activations are (time, channels); outputs are written
# directly in the module's (B, T_out, C) layout -> no wrapper transpose).
# ----------------------------------------------------------------------------
def upsample_fused_kernel(off_m_ref, off_a_ref,              # scalar prefetch (SMEM)
                          m_ref, wm_ref, wa_ref,              # per-tile inputs
                          w_in_ref, bn0s_ref, bn0b_ref,       # MelResNet weights
                          wr1_ref, wr2_ref, bn1s_ref, bn1b_ref,
                          bn2s_ref, bn2b_ref, w_out_ref, b_out_ref,
                          mup_ref, aux_ref):                  # outputs (time-major)
    j = pl.program_id(1)

    # ---- mel branch: banded linear interpolation ([indent:-indent] slice and
    #      the 0.045 gain are folded into the band weights on the host) -------
    band_m = wm_ref.shape[2]
    off_m = pl.multiple_of(off_m_ref[j], 8)
    xm = m_ref[0, pl.ds(off_m, band_m), :]                    # (band_m, Cin) f32
    mup_ref[0] = jnp.dot(wm_ref[0], xm,
                         preferred_element_type=jnp.float32).astype(mup_ref.dtype)

    # ---- aux branch: MelResNet on exactly the frame band this tile needs
    #      (resnet is time-local, receptive field == k), then a banded
    #      interpolation of that band.  Nothing big ever leaves VMEM. ---------
    band_a = wa_ref.shape[2]
    k = w_in_ref.shape[0]
    nb = wr1_ref.shape[0]
    off_a = pl.multiple_of(off_a_ref[j], 8)
    xa = m_ref[0, pl.ds(off_a, band_a + k - 1), :].astype(jnp.bfloat16)

    # conv_in (kernel size k, valid, no bias): k accumulating tap matmuls.
    h = jnp.dot(xa[0:band_a, :], w_in_ref[0],
                preferred_element_type=jnp.float32)
    for tap in range(1, k):
        h = h + jnp.dot(xa[tap:tap + band_a, :], w_in_ref[tap],
                        preferred_element_type=jnp.float32)
    # folded BatchNorm (eval) + relu, f32 on the VPU
    h = jnp.maximum(h * bn0s_ref[...] + bn0b_ref[...], 0.0)

    def res_block(i, h):
        y = jnp.dot(h.astype(jnp.bfloat16), wr1_ref[i],
                    preferred_element_type=jnp.float32)
        y = jnp.maximum(y * bn1s_ref[i] + bn1b_ref[i], 0.0)
        y = jnp.dot(y.astype(jnp.bfloat16), wr2_ref[i],
                    preferred_element_type=jnp.float32)
        return y * bn2s_ref[i] + bn2b_ref[i] + h

    h = lax.fori_loop(0, nb, res_block, h, unroll=True)

    # conv_out (1x1, bias)
    res = jnp.dot(h.astype(jnp.bfloat16), w_out_ref[...],
                  preferred_element_type=jnp.float32) + b_out_ref[...]

    # banded aux interpolation -> (t_tile, R), stored time-major in bf16
    aux_ref[0] = jnp.dot(wa_ref[0], res,
                         preferred_element_type=jnp.float32).astype(aux_ref.dtype)


def mel_interp_kernel(off_m_ref, m_ref, wm_ref, mup_ref):
    """use_aux_net=False path: banded mel interpolation only."""
    j = pl.program_id(1)
    band_m = wm_ref.shape[2]
    off_m = pl.multiple_of(off_m_ref[j], 8)
    xm = m_ref[0, pl.ds(off_m, band_m), :]
    mup_ref[0] = jnp.dot(wm_ref[0], xm,
                         preferred_element_type=jnp.float32).astype(mup_ref.dtype)


# ----------------------------------------------------------------------------
# Host-side helpers: interpolation matrices, banding, tiling, VMEM estimate
# ----------------------------------------------------------------------------
def linear_interp_matrix(t_in, scale):
    """(t_out, t_in) matrix replicating F.interpolate(mode='linear', align_corners=True)."""
    t_out = int(t_in * scale)
    if t_out == 1:
        pos = np.zeros((1,), np.float64)
    else:
        pos = np.arange(t_out, dtype=np.float64) * (t_in - 1) / (t_out - 1)
    lo = np.clip(np.floor(pos).astype(np.int64), 0, t_in - 1)
    hi = np.minimum(lo + 1, t_in - 1)
    frac = pos - lo
    W = np.zeros((t_out, t_in), np.float32)
    W[np.arange(t_out), lo] += (1.0 - frac).astype(np.float32)
    W[np.arange(t_out), hi] += frac.astype(np.float32)
    return W


def _pick_time_tile(t_out, t_tile_max):
    """Largest tile <= t_tile_max dividing t_out; prefer multiples of 128, then 8."""
    if t_out <= t_tile_max:
        return t_out
    best8 = None
    for tt in range(min(t_tile_max, t_out), 0, -1):
        if t_out % tt:
            continue
        if tt % 128 == 0:
            return tt
        if best8 is None and tt % 8 == 0:
            best8 = tt
    return best8 if best8 is not None else t_out  # fallback: single tile (always correct)


def _build_band(w_full, n_tiles, t_tile, align=8):
    """Slice a dense (t_out, t_in) interp matrix into per-tile bands.

    Returns (w_band (n_tiles, t_tile, band) f32,
             offs   (n_tiles,) int32  -- 8-aligned input-frame start per tile,
             band   int (multiple of `align`)).
    Band columns past the true input length are zero, so reads of zero-padded
    input rows contribute nothing.
    """
    t_out, t_in = w_full.shape
    offs = np.zeros((n_tiles,), np.int32)
    spans = []
    for j in range(n_tiles):
        sub = w_full[j * t_tile:(j + 1) * t_tile]
        nz = np.nonzero(np.any(sub != 0.0, axis=0))[0]
        lo = int(nz[0]) if nz.size else 0
        hi = int(nz[-1]) if nz.size else 0
        lo = (lo // align) * align
        offs[j] = lo
        spans.append((lo, hi))
    band = max(hi - lo + 1 for lo, hi in spans)
    band = _round_up(band, align)
    w_band = np.zeros((n_tiles, t_tile, band), np.float32)
    for j in range(n_tiles):
        lo = int(offs[j])
        width = min(band, t_in - lo)
        if width > 0:
            w_band[j, :, :width] = w_full[j * t_tile:(j + 1) * t_tile, lo:lo + width]
    return w_band, offs, band


def _vmem_limit_bytes(blocks):
    """Crude padded/double-buffered VMEM estimate -> explicit scoped limit."""
    total = 0
    for shape, dtype in blocks:
        if len(shape) >= 2:
            lead = int(np.prod(shape[:-2])) if len(shape) > 2 else 1
            n = lead * _round_up(shape[-2], 8) * _round_up(shape[-1], 128)
        else:
            n = _round_up(int(np.prod(shape)), 128)
        total += 2 * n * np.dtype(dtype).itemsize
    return int(max(total + (8 << 20), 32 << 20))


def _prep_kernel_params(p):
    """PyTorch-layout params -> time-major kernel layout (bf16 MXU weights)."""
    Cc, Cin, k = p["w_in"].shape
    nb = p["wr1"].shape[0]
    R = p["w_out"].shape[0]
    return {
        "w_in_t": jnp.transpose(p["w_in"], (2, 1, 0)).astype(jnp.bfloat16),   # (k, Cin, Cc)
        "bn0_s": p["bn0_s"].reshape(1, Cc),
        "bn0_b": p["bn0_b"].reshape(1, Cc),
        "wr1_t": jnp.transpose(p["wr1"], (0, 2, 1)).astype(jnp.bfloat16),     # (nb, Cc, Cc)
        "wr2_t": jnp.transpose(p["wr2"], (0, 2, 1)).astype(jnp.bfloat16),
        "bn1_s": p["bn1_s"].reshape(nb, 1, Cc),
        "bn1_b": p["bn1_b"].reshape(nb, 1, Cc),
        "bn2_s": p["bn2_s"].reshape(nb, 1, Cc),
        "bn2_b": p["bn2_b"].reshape(nb, 1, Cc),
        "w_out_t": jnp.transpose(p["w_out"], (1, 0)).astype(jnp.bfloat16),    # (Cc, R)
        "b_out": p["b_out"].reshape(1, R),
    }


# ----------------------------------------------------------------------------
# Forward
# ----------------------------------------------------------------------------
def upsample_forward(m_ncw, params, scale, pad, use_aux_net=True,
                     t_tile_max=512, out_dtype=jnp.bfloat16):
    """Forward of `Upsample`.  m_ncw is PyTorch NCW: (batch, feat_dims, time).

    Returns (mel_up (B, T_out, feat_dims), aux (B, T_out, res_out_dims) | None),
    already in the module's time-major layout (no wrapper transpose), dtype
    `out_dtype` (bf16 halves the dominant HBM write stream).
    """
    assert isinstance(scale, int), "integer upsampling factor expected"
    B, Cin, T = m_ncw.shape
    assert pad >= 1, "pad must be >= 1 (module slices m[..., indent:-indent])"
    assert T > 2 * pad
    k = 2 * pad + 1
    Tp = T - (k - 1)
    indent = pad * scale
    t_out = (T - 2 * pad) * scale          # == T*scale - 2*indent == Tp*scale

    t_tile = _pick_time_tile(t_out, t_tile_max)
    n_tiles = t_out // t_tile

    # Dense interp matrices exist only on the host; kernels see per-tile bands.
    w_m_full = linear_interp_matrix(T, scale)[indent:-indent] * 0.045
    wm_band, off_m, band_m = _build_band(w_m_full, n_tiles, t_tile)

    if not use_aux_net:
        t_pad = _round_up(max(T, int(off_m.max()) + band_m), 8)
        m_tm = jnp.pad(jnp.transpose(m_ncw, (0, 2, 1)).astype(jnp.float32),
                       ((0, 0), (0, t_pad - T), (0, 0)))
        vmem = _vmem_limit_bytes([((1, t_pad, Cin), jnp.float32),
                                  ((1, t_tile, band_m), jnp.float32),
                                  ((1, t_tile, Cin), out_dtype)])
        mel_up = pl.pallas_call(
            mel_interp_kernel,
            out_shape=jax.ShapeDtypeStruct((B, t_out, Cin), out_dtype),
            grid_spec=pltpu.PrefetchScalarGridSpec(
                num_scalar_prefetch=1,
                grid=(B, n_tiles),
                in_specs=[
                    pl.BlockSpec((1, t_pad, Cin), lambda b, j, om: (b, 0, 0)),
                    pl.BlockSpec((1, t_tile, band_m), lambda b, j, om: (j, 0, 0)),
                ],
                out_specs=pl.BlockSpec((1, t_tile, Cin), lambda b, j, om: (b, j, 0))),
            compiler_params=pltpu.CompilerParams(
                dimension_semantics=("parallel", "parallel"),
                vmem_limit_bytes=vmem),
        )(jnp.asarray(off_m, jnp.int32), m_tm, jnp.asarray(wm_band))
        return mel_up, None

    wa_band, off_a, band_a = _build_band(linear_interp_matrix(Tp, scale), n_tiles, t_tile)
    # pad mel along time so every banded slice (mel band, and the resnet's
    # band + k - 1 extra frames) stays in bounds; padded rows have zero weight.
    t_pad = _round_up(max(T, int(off_m.max()) + band_m,
                          int(off_a.max()) + band_a + k - 1), 8)
    m_tm = jnp.pad(jnp.transpose(m_ncw, (0, 2, 1)).astype(jnp.float32),
                   ((0, 0), (0, t_pad - T), (0, 0)))

    kp = _prep_kernel_params(params)
    Cc = params["w_in"].shape[0]
    R = params["w_out"].shape[0]

    def const(shape):
        zeros = (0,) * len(shape)
        return pl.BlockSpec(shape, lambda b, j, om, oa: zeros)

    in_specs = [
        pl.BlockSpec((1, t_pad, Cin), lambda b, j, om, oa: (b, 0, 0)),
        pl.BlockSpec((1, t_tile, band_m), lambda b, j, om, oa: (j, 0, 0)),
        pl.BlockSpec((1, t_tile, band_a), lambda b, j, om, oa: (j, 0, 0)),
        const(kp["w_in_t"].shape),
        const(kp["bn0_s"].shape), const(kp["bn0_b"].shape),
        const(kp["wr1_t"].shape), const(kp["wr2_t"].shape),
        const(kp["bn1_s"].shape), const(kp["bn1_b"].shape),
        const(kp["bn2_s"].shape), const(kp["bn2_b"].shape),
        const(kp["w_out_t"].shape), const(kp["b_out"].shape),
    ]
    out_specs = (
        pl.BlockSpec((1, t_tile, Cin), lambda b, j, om, oa: (b, j, 0)),
        pl.BlockSpec((1, t_tile, R), lambda b, j, om, oa: (b, j, 0)),
    )
    out_shape = (jax.ShapeDtypeStruct((B, t_out, Cin), out_dtype),
                 jax.ShapeDtypeStruct((B, t_out, R), out_dtype))

    vmem = _vmem_limit_bytes([
        ((1, t_pad, Cin), jnp.float32),
        ((1, t_tile, band_m), jnp.float32),
        ((1, t_tile, band_a), jnp.float32),
        (tuple(kp["w_in_t"].shape), jnp.bfloat16),
        (tuple(kp["wr1_t"].shape), jnp.bfloat16),
        (tuple(kp["wr2_t"].shape), jnp.bfloat16),
        (tuple(kp["w_out_t"].shape), jnp.bfloat16),
        ((1, t_tile, Cin), out_dtype), ((1, t_tile, R), out_dtype)])

    mel_up, aux = pl.pallas_call(
        upsample_fused_kernel,
        out_shape=out_shape,
        grid_spec=pltpu.PrefetchScalarGridSpec(
            num_scalar_prefetch=2,
            grid=(B, n_tiles),
            in_specs=in_specs,
            out_specs=out_specs),
        compiler_params=pltpu.CompilerParams(
            dimension_semantics=("parallel", "parallel"),
            vmem_limit_bytes=vmem),
    )(jnp.asarray(off_m, jnp.int32), jnp.asarray(off_a, jnp.int32),
      m_tm, jnp.asarray(wm_band), jnp.asarray(wa_band),
      kp["w_in_t"], kp["bn0_s"], kp["bn0_b"],
      kp["wr1_t"], kp["wr2_t"], kp["bn1_s"], kp["bn1_b"],
      kp["bn2_s"], kp["bn2_b"], kp["w_out_t"], kp["b_out"])
    return mel_up, aux


# ----------------------------------------------------------------------------
# Parameters and pure-JAX f32 reference (same math, no Pallas)
# ----------------------------------------------------------------------------
def init_params(key, num_res_blocks, feat_dims, compute_dims, res_out_dims, pad):
    """Random params in PyTorch-like layout with BatchNorm folded (eval mode)."""
    k_size = 2 * pad + 1
    eps = 1e-5
    keys = jax.random.split(key, 16)

    def bn_affine(kg, kb, km, kv, shape):
        gamma = 1.0 + 0.1 * jax.random.normal(kg, shape, jnp.float32)
        beta = 0.1 * jax.random.normal(kb, shape, jnp.float32)
        mean = 0.1 * jax.random.normal(km, shape, jnp.float32)
        var = 1.0 + 0.1 * jnp.abs(jax.random.normal(kv, shape, jnp.float32))
        scale = gamma / jnp.sqrt(var + eps)
        shift = beta - mean * scale
        return scale, shift

    p = {}
    p["w_in"] = 0.1 * jax.random.normal(
        keys[0], (compute_dims, feat_dims, k_size), jnp.float32)
    p["bn0_s"], p["bn0_b"] = bn_affine(keys[1], keys[2], keys[3], keys[4],
                                       (compute_dims,))
    nb = num_res_blocks
    p["wr1"] = 0.1 * jax.random.normal(keys[5], (nb, compute_dims, compute_dims), jnp.float32)
    p["wr2"] = 0.1 * jax.random.normal(keys[6], (nb, compute_dims, compute_dims), jnp.float32)
    p["bn1_s"], p["bn1_b"] = bn_affine(keys[7], keys[8], keys[9], keys[10],
                                       (nb, compute_dims))
    p["bn2_s"], p["bn2_b"] = bn_affine(keys[11], keys[12], keys[13], keys[14],
                                       (nb, compute_dims))
    p["w_out"] = 0.1 * jax.random.normal(keys[15], (res_out_dims, compute_dims), jnp.float32)
    p["b_out"] = 0.01 * jnp.arange(res_out_dims, dtype=jnp.float32)
    return p


def reference_forward(m_bct, p, scale, pad, use_aux_net=True):
    B, Cin, T = m_bct.shape
    k = p["w_in"].shape[2]
    Tp = T - (k - 1)
    aux_out = None
    if use_aux_net:
        h = jnp.zeros((B, p["w_in"].shape[0], Tp), jnp.float32)
        for tap in range(k):
            h = h + jnp.einsum("oc,bct->bot", p["w_in"][:, :, tap],
                               m_bct[:, :, tap:tap + Tp])
        h = jnp.maximum(h * p["bn0_s"][None, :, None] + p["bn0_b"][None, :, None], 0.0)
        for i in range(p["wr1"].shape[0]):
            res = h
            y = jnp.einsum("oc,bct->bot", p["wr1"][i], h)
            y = jnp.maximum(y * p["bn1_s"][i][None, :, None] + p["bn1_b"][i][None, :, None], 0.0)
            y = jnp.einsum("oc,bct->bot", p["wr2"][i], y)
            y = y * p["bn2_s"][i][None, :, None] + p["bn2_b"][i][None, :, None]
            h = y + res
        aux = jnp.einsum("rc,bct->brt", p["w_out"], h) + p["b_out"][None, :, None]
        W_aux = jnp.asarray(linear_interp_matrix(Tp, scale))
        aux_out = jnp.einsum("ot,brt->bor", W_aux, aux)
    indent = pad * scale
    W_m = jnp.asarray(linear_interp_matrix(T, scale)[indent:-indent])
    m_up = jnp.einsum("ot,bct->boc", W_m, m_bct) * 0.045
    return m_up, aux_out


if __name__ == "__main__":
    scale, pad, num_res_blocks = 4, 2, 2
    feat_dims, compute_dims, res_out_dims = 16, 32, 16
    B, T = 2, 12  # T must exceed 2*pad

    key = jax.random.PRNGKey(0)
    k_params, k_input = jax.random.split(key)
    params = init_params(k_params, num_res_blocks, feat_dims, compute_dims,
                         res_out_dims, pad)

    # input in PyTorch NCW layout: (batch, feat_dims, time)
    m = jax.random.normal(k_input, (B, feat_dims, T), jnp.float32)

    # t_tile_max=16 forces multiple output-time tiles even at this toy size so
    # the banded/tiled path is actually exercised (production default is 512).
    m_out, aux_out = upsample_forward(m, params, scale, pad, use_aux_net=True,
                                      t_tile_max=16)
    jax.block_until_ready((m_out, aux_out))

    t_out = (T - 2 * pad) * scale
    assert m_out.shape == (B, t_out, feat_dims)
    assert aux_out.shape == (B, t_out, res_out_dims)

    m_expected, aux_expected = reference_forward(m, params, scale, pad, use_aux_net=True)
    # bf16 MXU operands / bf16 outputs -> compare against f32 reference loosely
    np.testing.assert_allclose(np.asarray(m_out).astype(np.float32),
                               np.asarray(m_expected), rtol=5e-2, atol=5e-2)
    np.testing.assert_allclose(np.asarray(aux_out).astype(np.float32),
                               np.asarray(aux_expected), rtol=5e-2, atol=5e-2)

    # also exercise the use_aux_net=False path (standalone interpolation kernel)
    m_out2, aux_none = upsample_forward(m, params, scale, pad, use_aux_net=False,
                                        t_tile_max=16)
    jax.block_until_ready(m_out2)
    assert aux_none is None
    np.testing.assert_allclose(np.asarray(m_out2).astype(np.float32),
                               np.asarray(m_expected), rtol=5e-2, atol=5e-2)

    print("KERNEL_OK")
</pallas_src>

<mosaic_0001>
module attributes {stable_mosaic.version = 11 : i64} {
  func.func @upsample_fused_kernel(%arg0: i32, %arg1: i32, %arg2: memref<2xi32, #tpu.memory_space<smem>>, %arg3: memref<2xi32, #tpu.memory_space<smem>>, %arg4: memref<1x16x16xf32, #tpu.memory_space<vmem>>, %arg5: memref<1x16x16xf32, #tpu.memory_space<vmem>>, %arg6: memref<1x16x8xf32, #tpu.memory_space<vmem>>, %arg7: memref<5x16x32xbf16, #tpu.memory_space<vmem>>, %arg8: memref<1x32xf32, #tpu.memory_space<vmem>>, %arg9: memref<1x32xf32, #tpu.memory_space<vmem>>, %arg10: memref<2x32x32xbf16, #tpu.memory_space<vmem>>, %arg11: memref<2x32x32xbf16, #tpu.memory_space<vmem>>, %arg12: memref<2x1x32xf32, #tpu.memory_space<vmem>>, %arg13: memref<2x1x32xf32, #tpu.memory_space<vmem>>, %arg14: memref<2x1x32xf32, #tpu.memory_space<vmem>>, %arg15: memref<2x1x32xf32, #tpu.memory_space<vmem>>, %arg16: memref<32x16xbf16, #tpu.memory_space<vmem>>, %arg17: memref<1x16xf32, #tpu.memory_space<vmem>>, %arg18: memref<1x16x16xbf16, #tpu.memory_space<vmem>>, %arg19: memref<1x16x16xbf16, #tpu.memory_space<vmem>>) attributes {dimension_semantics = [#tpu.dimension_semantics<parallel>, #tpu.dimension_semantics<parallel>], iteration_bounds = array<i64: 2, 2>, scalar_prefetch = 2 : i64, scratch_operands = 0 : i64, tpu.core_type = #tpu.core_type<tc>, window_params = [{transform_indices = @transform_0, window_bounds = array<i64: 1, 16, 16>}, {transform_indices = @transform_1, window_bounds = array<i64: 1, 16, 16>}, {transform_indices = @transform_2, window_bounds = array<i64: 1, 16, 8>}, {pipeline_mode = #tpu.pipeline_mode<synchronous>, transform_indices = @transform_3, window_bounds = array<i64: 5, 16, 32>}, {pipeline_mode = #tpu.pipeline_mode<synchronous>, transform_indices = @transform_4, window_bounds = array<i64: 1, 32>}, {pipeline_mode = #tpu.pipeline_mode<synchronous>, transform_indices = @transform_5, window_bounds = array<i64: 1, 32>}, {pipeline_mode = #tpu.pipeline_mode<synchronous>, transform_indices = @transform_6, window_bounds = array<i64: 2, 32, 32>}, {pipeline_mode = #tpu.pipeline_mode<synchronous>, transform_indices = @transform_7, window_bounds = array<i64: 2, 32, 32>}, {pipeline_mode = #tpu.pipeline_mode<synchronous>, transform_indices = @transform_8, window_bounds = array<i64: 2, 1, 32>}, {pipeline_mode = #tpu.pipeline_mode<synchronous>, transform_indices = @transform_9, window_bounds = array<i64: 2, 1, 32>}, {pipeline_mode = #tpu.pipeline_mode<synchronous>, transform_indices = @transform_10, window_bounds = array<i64: 2, 1, 32>}, {pipeline_mode = #tpu.pipeline_mode<synchronous>, transform_indices = @transform_11, window_bounds = array<i64: 2, 1, 32>}, {pipeline_mode = #tpu.pipeline_mode<synchronous>, transform_indices = @transform_12, window_bounds = array<i64: 32, 16>}, {pipeline_mode = #tpu.pipeline_mode<synchronous>, transform_indices = @transform_13, window_bounds = array<i64: 1, 16>}, {transform_indices = @transform_14, window_bounds = array<i64: 1, 16, 16>}, {transform_indices = @transform_15, window_bounds = array<i64: 1, 16, 16>}]} {
    %0 = arith.index_cast %arg1 : i32 to index
    %1 = memref.load %arg2[%0] : memref<2xi32, #tpu.memory_space<smem>>
    %2 = tpu.assume_multiple %1, 8 : i32
    %c0 = arith.constant 0 : index
    %3 = arith.index_cast %2 : i32 to index
    %c0_0 = arith.constant 0 : index
    %4 = vector.load %arg4[%c0, %3, %c0_0] : memref<1x16x16xf32, #tpu.memory_space<vmem>>, vector<1x16x16xf32>
    %5 = vector.shape_cast %4 : vector<1x16x16xf32> to vector<16x16xf32>
    %c0_1 = arith.constant 0 : index
    %c0_2 = arith.constant 0 : index
    %c0_3 = arith.constant 0 : index
    %6 = vector.load %arg5[%c0_1, %c0_2, %c0_3] : memref<1x16x16xf32, #tpu.memory_space<vmem>>, vector<1x16x16xf32>
    %7 = vector.shape_cast %6 : vector<1x16x16xf32> to vector<16x16xf32>
    %cst = arith.constant dense<0.000000e+00> : vector<16x16xf32>
    %8 = tpu.matmul %7, %5, %cst {dimension_numbers = #tpu.dot_dimension_numbers<[1], [0], [0], [1], [0, 0, 1, 1], [], []>} : vector<16x16xf32>, vector<16x16xf32>, vector<16x16xf32> -> vector<16x16xf32>
    %9 = arith.truncf %8 : vector<16x16xf32> to vector<16x16xbf16>
    %c0_4 = arith.constant 0 : index
    %c0_5 = arith.constant 0 : index
    %c0_6 = arith.constant 0 : index
    %10 = vector.load %arg18[%c0_4, %c0_5, %c0_6] : memref<1x16x16xbf16, #tpu.memory_space<vmem>>, vector<1x16x16xbf16>
    %11 = vector.shape_cast %10 : vector<1x16x16xbf16> to vector<16x16xbf16>
    %12 = vector.shape_cast %9 : vector<16x16xbf16> to vector<1x16x16xbf16>
    tpu.vector_store %arg18[%c0_4, %c0_5, %c0_6], %12 {strides = array<i32>} : memref<1x16x16xbf16, #tpu.memory_space<vmem>>, vector<1x16x16xbf16>,
    %13 = arith.index_cast %arg1 : i32 to index
    %14 = memref.load %arg3[%13] : memref<2xi32, #tpu.memory_space<smem>>
    %15 = tpu.assume_multiple %14, 8 : i32
    %c0_7 = arith.constant 0 : index
    %16 = arith.index_cast %15 : i32 to index
    %c0_8 = arith.constant 0 : index
    %17 = vector.load %arg4[%c0_7, %16, %c0_8] : memref<1x16x16xf32, #tpu.memory_space<vmem>>, vector<1x12x16xf32>
    %18 = vector.shape_cast %17 : vector<1x12x16xf32> to vector<12x16xf32>
    %19 = arith.truncf %18 : vector<12x16xf32> to vector<12x16xbf16>
    %20 = vector.extract_strided_slice %19 {offsets = [0, 0], sizes = [8, 16], strides = [1, 1]} : vector<12x16xbf16> to vector<8x16xbf16>
    %c0_9 = arith.constant 0 : index
    %c0_10 = arith.constant 0 : index
    %c0_11 = arith.constant 0 : index
    %21 = vector.load %arg7[%c0_9, %c0_10, %c0_11] : memref<5x16x32xbf16, #tpu.memory_space<vmem>>, vector<1x16x32xbf16>
    %22 = vector.shape_cast %21 : vector<1x16x32xbf16> to vector<16x32xbf16>
    %cst_12 = arith.constant dense<0.000000e+00> : vector<8x32xf32>
    %23 = tpu.matmul %20, %22, %cst_12 {dimension_numbers = #tpu.dot_dimension_numbers<[1], [0], [0], [1], [0, 0, 1, 1], [], []>} : vector<8x16xbf16>, vector<16x32xbf16>, vector<8x32xf32> -> vector<8x32xf32>
    %24 = vector.extract_strided_slice %19 {offsets = [1, 0], sizes = [8, 16], strides = [1, 1]} : vector<12x16xbf16> to vector<8x16xbf16>
    %c1 = arith.constant 1 : index
    %c0_13 = arith.constant 0 : index
    %c0_14 = arith.constant 0 : index
    %25 = vector.load %arg7[%c1, %c0_13, %c0_14] : memref<5x16x32xbf16, #tpu.memory_space<vmem>>, vector<1x16x32xbf16>
    %26 = vector.shape_cast %25 : vector<1x16x32xbf16> to vector<16x32xbf16>
    %cst_15 = arith.constant dense<0.000000e+00> : vector<8x32xf32>
    %27 = tpu.matmul %24, %26, %cst_15 {dimension_numbers = #tpu.dot_dimension_numbers<[1], [0], [0], [1], [0, 0, 1, 1], [], []>} : vector<8x16xbf16>, vector<16x32xbf16>, vector<8x32xf32> -> vector<8x32xf32>
    %28 = arith.addf %23, %27 : vector<8x32xf32>
    %29 = vector.extract_strided_slice %19 {offsets = [2, 0], sizes = [8, 16], strides = [1, 1]} : vector<12x16xbf16> to vector<8x16xbf16>
    %c2 = arith.constant 2 : index
    %c0_16 = arith.constant 0 : index
    %c0_17 = arith.constant 0 : index
    %30 = vector.load %arg7[%c2, %c0_16, %c0_17] : memref<5x16x32xbf16, #tpu.memory_space<vmem>>, vector<1x16x32xbf16>
    %31 = vector.shape_cast %30 : vector<1x16x32xbf16> to vector<16x32xbf16>
    %cst_18 = arith.constant dense<0.000000e+00> : vector<8x32xf32>
    %32 = tpu.matmul %29, %31, %cst_18 {dimension_numbers = #tpu.dot_dimension_numbers<[1], [0], [0], [1], [0, 0, 1, 1], [], []>} : vector<8x16xbf16>, vector<16x32xbf16>, vector<8x32xf32> -> vector<8x32xf32>
    %33 = arith.addf %28, %32 : vector<8x32xf32>
    %34 = vector.extract_strided_slice %19 {offsets = [3, 0], sizes = [8, 16], strides = [1, 1]} : vector<12x16xbf16> to vector<8x16xbf16>
    %c3 = arith.constant 3 : index
    %c0_19 = arith.constant 0 : index
    %c0_20 = arith.constant 0 : index
    %35 = vector.load %arg7[%c3, %c0_19, %c0_20] : memref<5x16x32xbf16, #tpu.memory_space<vmem>>, vector<1x16x32xbf16>
    %36 = vector.shape_cast %35 : vector<1x16x32xbf16> to vector<16x32xbf16>
    %cst_21 = arith.constant dense<0.000000e+00> : vector<8x32xf32>
    %37 = tpu.matmul %34, %36, %cst_21 {dimension_numbers = #tpu.dot_dimension_numbers<[1], [0], [0], [1], [0, 0, 1, 1], [], []>} : vector<8x16xbf16>, vector<16x32xbf16>, vector<8x32xf32> -> vector<8x32xf32>
    %38 = arith.addf %33, %37 : vector<8x32xf32>
    %39 = vector.extract_strided_slice %19 {offsets = [4, 0], sizes = [8, 16], strides = [1, 1]} : vector<12x16xbf16> to vector<8x16xbf16>
    %c4 = arith.constant 4 : index
    %c0_22 = arith.constant 0 : index
    %c0_23 = arith.constant 0 : index
    %40 = vector.load %arg7[%c4, %c0_22, %c0_23] : memref<5x16x32xbf16, #tpu.memory_space<vmem>>, vector<1x16x32xbf16>
    %41 = vector.shape_cast %40 : vector<1x16x32xbf16> to vector<16x32xbf16>
    %cst_24 = arith.constant dense<0.000000e+00> : vector<8x32xf32>
    %42 = tpu.matmul %39, %41, %cst_24 {dimension_numbers = #tpu.dot_dimension_numbers<[1], [0], [0], [1], [0, 0, 1, 1], [], []>} : vector<8x16xbf16>, vector<16x32xbf16>, vector<8x32xf32> -> vector<8x32xf32>
    %43 = arith.addf %38, %42 : vector<8x32xf32>
    %c0_25 = arith.constant 0 : index
    %c0_26 = arith.constant 0 : index
    %44 = vector.load %arg8[%c0_25, %c0_26] : memref<1x32xf32, #tpu.memory_space<vmem>>, vector<1x32xf32>
    %45 = vector.broadcast %44 : vector<1x32xf32> to vector<8x32xf32>
    %46 = arith.mulf %43, %45 : vector<8x32xf32>
    %c0_27 = arith.constant 0 : index
    %c0_28 = arith.constant 0 : index
    %47 = vector.load %arg9[%c0_27, %c0_28] : memref<1x32xf32, #tpu.memory_space<vmem>>, vector<1x32xf32>
    %48 = vector.broadcast %47 : vector<1x32xf32> to vector<8x32xf32>
    %49 = arith.addf %46, %48 : vector<8x32xf32>
    %cst_29 = arith.constant 0.000000e+00 : f32
    %50 = vector.broadcast %cst_29 : f32 to vector<8x32xf32>
    %51 = arith.maximumf %49, %50 : vector<8x32xf32>
    %c0_i32 = arith.constant 0 : i32
    %52 = arith.truncf %51 : vector<8x32xf32> to vector<8x32xbf16>
    %53 = arith.index_cast %c0_i32 : i32 to index
    %c0_30 = arith.constant 0 : index
    %c0_31 = arith.constant 0 : index
    %54 = vector.load %arg10[%53, %c0_30, %c0_31] : memref<2x32x32xbf16, #tpu.memory_space<vmem>>, vector<1x32x32xbf16>
    %55 = vector.shape_cast %54 : vector<1x32x32xbf16> to vector<32x32xbf16>
    %cst_32 = arith.constant dense<0.000000e+00> : vector<8x32xf32>
    %56 = tpu.matmul %52, %55, %cst_32 {dimension_numbers = #tpu.dot_dimension_numbers<[1], [0], [0], [1], [0, 0, 1, 1], [], []>} : vector<8x32xbf16>, vector<32x32xbf16>, vector<8x32xf32> -> vector<8x32xf32>
    %57 = arith.index_cast %c0_i32 : i32 to index
    %c0_33 = arith.constant 0 : index
    %c0_34 = arith.constant 0 : index
    %58 = vector.load %arg12[%57, %c0_33, %c0_34] : memref<2x1x32xf32, #tpu.memory_space<vmem>>, vector<1x1x32xf32>
    %59 = vector.shape_cast %58 : vector<1x1x32xf32> to vector<1x32xf32>
    %60 = vector.broadcast %59 : vector<1x32xf32> to vector<8x32xf32>
    %61 = arith.mulf %56, %60 : vector<8x32xf32>
    %62 = arith.index_cast %c0_i32 : i32 to index
    %c0_35 = arith.constant 0 : index
    %c0_36 = arith.constant 0 : index
    %63 = vector.load %arg13[%62, %c0_35, %c0_36] : memref<2x1x32xf32, #tpu.memory_space<vmem>>, vector<1x1x32xf32>
    %64 = vector.shape_cast %63 : vector<1x1x32xf32> to vector<1x32xf32>
    %65 = vector.broadcast %64 : vector<1x32xf32> to vector<8x32xf32>
    %66 = arith.addf %61, %65 : vector<8x32xf32>
    %cst_37 = arith.constant 0.000000e+00 : f32
    %67 = vector.broadcast %cst_37 : f32 to vector<8x32xf32>
    %68 = arith.maximumf %66, %67 : vector<8x32xf32>
    %69 = arith.truncf %68 : vector<8x32xf32> to vector<8x32xbf16>
    %70 = arith.index_cast %c0_i32 : i32 to index
    %c0_38 = arith.constant 0 : index
    %c0_39 = arith.constant 0 : index
    %71 = vector.load %arg11[%70, %c0_38, %c0_39] : memref<2x32x32xbf16, #tpu.memory_space<vmem>>, vector<1x32x32xbf16>
    %72 = vector.shape_cast %71 : vector<1x32x32xbf16> to vector<32x32xbf16>
    %cst_40 = arith.constant dense<0.000000e+00> : vector<8x32xf32>
    %73 = tpu.matmul %69, %72, %cst_40 {dimension_numbers = #tpu.dot_dimension_numbers<[1], [0], [0], [1], [0, 0, 1, 1], [], []>} : vector<8x32xbf16>, vector<32x32xbf16>, vector<8x32xf32> -> vector<8x32xf32>
    %74 = arith.index_cast %c0_i32 : i32 to index
    %c0_41 = arith.constant 0 : index
    %c0_42 = arith.constant 0 : index
    %75 = vector.load %arg14[%74, %c0_41, %c0_42] : memref<2x1x32xf32, #tpu.memory_space<vmem>>, vector<1x1x32xf32>
    %76 = vector.shape_cast %75 : vector<1x1x32xf32> to vector<1x32xf32>
    %77 = vector.broadcast %76 : vector<1x32xf32> to vector<8x32xf32>
    %78 = arith.mulf %73, %77 : vector<8x32xf32>
    %79 = arith.index_cast %c0_i32 : i32 to index
    %c0_43 = arith.constant 0 : index
    %c0_44 = arith.constant 0 : index
    %80 = vector.load %arg15[%79, %c0_43, %c0_44] : memref<2x1x32xf32, #tpu.memory_space<vmem>>, vector<1x1x32xf32>
    %81 = vector.shape_cast %80 : vector<1x1x32xf32> to vector<1x32xf32>
    %82 = vector.broadcast %81 : vector<1x32xf32> to vector<8x32xf32>
    %83 = arith.addf %78, %82 : vector<8x32xf32>
    %84 = arith.addf %83, %51 : vector<8x32xf32>
    %c1_i32 = arith.constant 1 : i32
    %85 = arith.truncf %84 : vector<8x32xf32> to vector<8x32xbf16>
    %86 = arith.index_cast %c1_i32 : i32 to index
    %c0_45 = arith.constant 0 : index
    %c0_46 = arith.constant 0 : index
    %87 = vector.load %arg10[%86, %c0_45, %c0_46] : memref<2x32x32xbf16, #tpu.memory_space<vmem>>, vector<1x32x32xbf16>
    %88 = vector.shape_cast %87 : vector<1x32x32xbf16> to vector<32x32xbf16>
    %cst_47 = arith.constant dense<0.000000e+00> : vector<8x32xf32>
    %89 = tpu.matmul %85, %88, %cst_47 {dimension_numbers = #tpu.dot_dimension_numbers<[1], [0], [0], [1], [0, 0, 1, 1], [], []>} : vector<8x32xbf16>, vector<32x32xbf16>, vector<8x32xf32> -> vector<8x32xf32>
    %90 = arith.index_cast %c1_i32 : i32 to index
    %c0_48 = arith.constant 0 : index
    %c0_49 = arith.constant 0 : index
    %91 = vector.load %arg12[%90, %c0_48, %c0_49] : memref<2x1x32xf32, #tpu.memory_space<vmem>>, vector<1x1x32xf32>
    %92 = vector.shape_cast %91 : vector<1x1x32xf32> to vector<1x32xf32>
    %93 = vector.broadcast %92 : vector<1x32xf32> to vector<8x32xf32>
    %94 = arith.mulf %89, %93 : vector<8x32xf32>
    %95 = arith.index_cast %c1_i32 : i32 to index
    %c0_50 = arith.constant 0 : index
    %c0_51 = arith.constant 0 : index
    %96 = vector.load %arg13[%95, %c0_50, %c0_51] : memref<2x1x32xf32, #tpu.memory_space<vmem>>, vector<1x1x32xf32>
    %97 = vector.shape_cast %96 : vector<1x1x32xf32> to vector<1x32xf32>
    %98 = vector.broadcast %97 : vector<1x32xf32> to vector<8x32xf32>
    %99 = arith.addf %94, %98 : vector<8x32xf32>
    %cst_52 = arith.constant 0.000000e+00 : f32
    %100 = vector.broadcast %cst_52 : f32 to vector<8x32xf32>
    %101 = arith.maximumf %99, %100 : vector<8x32xf32>
    %102 = arith.truncf %101 : vector<8x32xf32> to vector<8x32xbf16>
    %103 = arith.index_cast %c1_i32 : i32 to index
    %c0_53 = arith.constant 0 : index
    %c0_54 = arith.constant 0 : index
    %104 = vector.load %arg11[%103, %c0_53, %c0_54] : memref<2x32x32xbf16, #tpu.memory_space<vmem>>, vector<1x32x32xbf16>
    %105 = vector.shape_cast %104 : vector<1x32x32xbf16> to vector<32x32xbf16>
    %cst_55 = arith.constant dense<0.000000e+00> : vector<8x32xf32>
    %106 = tpu.matmul %102, %105, %cst_55 {dimension_numbers = #tpu.dot_dimension_numbers<[1], [0], [0], [1], [0, 0, 1, 1], [], []>} : vector<8x32xbf16>, vector<32x32xbf16>, vector<8x32xf32> -> vector<8x32xf32>
    %107 = arith.index_cast %c1_i32 : i32 to index
    %c0_56 = arith.constant 0 : index
    %c0_57 = arith.constant 0 : index
    %108 = vector.load %arg14[%107, %c0_56, %c0_57] : memref<2x1x32xf32, #tpu.memory_space<vmem>>, vector<1x1x32xf32>
    %109 = vector.shape_cast %108 : vector<1x1x32xf32> to vector<1x32xf32>
    %110 = vector.broadcast %109 : vector<1x32xf32> to vector<8x32xf32>
    %111 = arith.mulf %106, %110 : vector<8x32xf32>
    %112 = arith.index_cast %c1_i32 : i32 to index
    %c0_58 = arith.constant 0 : index
    %c0_59 = arith.constant 0 : index
    %113 = vector.load %arg15[%112, %c0_58, %c0_59] : memref<2x1x32xf32, #tpu.memory_space<vmem>>, vector<1x1x32xf32>
    %114 = vector.shape_cast %113 : vector<1x1x32xf32> to vector<1x32xf32>
    %115 = vector.broadcast %114 : vector<1x32xf32> to vector<8x32xf32>
    %116 = arith.addf %111, %115 : vector<8x32xf32>
    %117 = arith.addf %116, %84 : vector<8x32xf32>
    %c2_i32 = arith.constant 2 : i32
    %118 = arith.truncf %117 : vector<8x32xf32> to vector<8x32xbf16>
    %c0_60 = arith.constant 0 : index
    %c0_61 = arith.constant 0 : index
    %119 = vector.load %arg16[%c0_60, %c0_61] : memref<32x16xbf16, #tpu.memory_space<vmem>>, vector<32x16xbf16>
    %cst_62 = arith.constant dense<0.000000e+00> : vector<8x16xf32>
    %120 = tpu.matmul %118, %119, %cst_62 {dimension_numbers = #tpu.dot_dimension_numbers<[1], [0], [0], [1], [0, 0, 1, 1], [], []>} : vector<8x32xbf16>, vector<32x16xbf16>, vector<8x16xf32> -> vector<8x16xf32>
    %c0_63 = arith.constant 0 : index
    %c0_64 = arith.constant 0 : index
    %121 = vector.load %arg17[%c0_63, %c0_64] : memref<1x16xf32, #tpu.memory_space<vmem>>, vector<1x16xf32>
    %122 = vector.broadcast %121 : vector<1x16xf32> to vector<8x16xf32>
    %123 = arith.addf %120, %122 : vector<8x16xf32>
    %c0_65 = arith.constant 0 : index
    %c0_66 = arith.constant 0 : index
    %c0_67 = arith.constant 0 : index
    %124 = vector.load %arg6[%c0_65, %c0_66, %c0_67] : memref<1x16x8xf32, #tpu.memory_space<vmem>>, vector<1x16x8xf32>
    %125 = vector.shape_cast %124 : vector<1x16x8xf32> to vector<16x8xf32>
    %cst_68 = arith.constant dense<0.000000e+00> : vector<16x16xf32>
    %126 = tpu.matmul %125, %123, %cst_68 {dimension_numbers = #tpu.dot_dimension_numbers<[1], [0], [0], [1], [0, 0, 1, 1], [], []>} : vector<16x8xf32>, vector<8x16xf32>, vector<16x16xf32> -> vector<16x16xf32>
    %127 = arith.truncf %126 : vector<16x16xf32> to vector<16x16xbf16>
    %c0_69 = arith.constant 0 : index
    %c0_70 = arith.constant 0 : index
    %c0_71 = arith.constant 0 : index
    %128 = vector.load %arg19[%c0_69, %c0_70, %c0_71] : memref<1x16x16xbf16, #tpu.memory_space<vmem>>, vector<1x16x16xbf16>
    %129 = vector.shape_cast %128 : vector<1x16x16xbf16> to vector<16x16xbf16>
    %130 = vector.shape_cast %127 : vector<16x16xbf16> to vector<1x16x16xbf16>
    tpu.vector_store %arg19[%c0_69, %c0_70, %c0_71], %130 {strides = array<i32>} : memref<1x16x16xbf16, #tpu.memory_space<vmem>>, vector<1x16x16xbf16>,
    return
  }
  func.func @transform_0(%arg0: i32, %arg1: i32, %arg2: memref<2xi32, #tpu.memory_space<smem>>, %arg3: memref<2xi32, #tpu.memory_space<smem>>) -> (i32, i32, i32) {
    %c0_i32 = arith.constant 0 : i32
    %c0_i32_0 = arith.constant 0 : i32
    %c0_i32_1 = arith.constant 0 : i32
    return %arg0, %c0_i32, %c0_i32_0 : i32, i32, i32
  }
  func.func @transform_1(%arg0: i32, %arg1: i32, %arg2: memref<2xi32, #tpu.memory_space<smem>>, %arg3: memref<2xi32, #tpu.memory_space<smem>>) -> (i32, i32, i32) {
    %c0_i32 = arith.constant 0 : i32
    %c0_i32_0 = arith.constant 0 : i32
    %c0_i32_1 = arith.constant 0 : i32
    return %arg1, %c0_i32, %c0_i32_0 : i32, i32, i32
  }
  func.func @transform_2(%arg0: i32, %arg1: i32, %arg2: memref<2xi32, #tpu.memory_space<smem>>, %arg3: memref<2xi32, #tpu.memory_space<smem>>) -> (i32, i32, i32) {
    %c0_i32 = arith.constant 0 : i32
    %c0_i32_0 = arith.constant 0 : i32
    %c0_i32_1 = arith.constant 0 : i32
    return %arg1, %c0_i32, %c0_i32_0 : i32, i32, i32
  }
  func.func @transform_3(%arg0: i32, %arg1: i32, %arg2: memref<2xi32, #tpu.memory_space<smem>>, %arg3: memref<2xi32, #tpu.memory_space<smem>>) -> (i32, i32, i32) {
    %c0_i32 = arith.constant 0 : i32
    %c0_i32_0 = arith.constant 0 : i32
    %c0_i32_1 = arith.constant 0 : i32
    %c0_i32_2 = arith.constant 0 : i32
    return %c0_i32, %c0_i32_0, %c0_i32_1 : i32, i32, i32
  }
  func.func @transform_4(%arg0: i32, %arg1: i32, %arg2: memref<2xi32, #tpu.memory_space<smem>>, %arg3: memref<2xi32, #tpu.memory_space<smem>>) -> (i32, i32) {
    %c0_i32 = arith.constant 0 : i32
    %c0_i32_0 = arith.constant 0 : i32
    %c0_i32_1 = arith.constant 0 : i32
    return %c0_i32, %c0_i32_0 : i32, i32
  }
  func.func @transform_5(%arg0: i32, %arg1: i32, %arg2: memref<2xi32, #tpu.memory_space<smem>>, %arg3: memref<2xi32, #tpu.memory_space<smem>>) -> (i32, i32) {
    %c0_i32 = arith.constant 0 : i32
    %c0_i32_0 = arith.constant 0 : i32
    %c0_i32_1 = arith.constant 0 : i32
    return %c0_i32, %c0_i32_0 : i32, i32
  }
  func.func @transform_6(%arg0: i32, %arg1: i32, %arg2: memref<2xi32, #tpu.memory_space<smem>>, %arg3: memref<2xi32, #tpu.memory_space<smem>>) -> (i32, i32, i32) {
    %c0_i32 = arith.constant 0 : i32
    %c0_i32_0 = arith.constant 0 : i32
    %c0_i32_1 = arith.constant 0 : i32
    %c0_i32_2 = arith.constant 0 : i32
    return %c0_i32, %c0_i32_0, %c0_i32_1 : i32, i32, i32
  }
  func.func @transform_7(%arg0: i32, %arg1: i32, %arg2: memref<2xi32, #tpu.memory_space<smem>>, %arg3: memref<2xi32, #tpu.memory_space<smem>>) -> (i32, i32, i32) {
    %c0_i32 = arith.constant 0 : i32
    %c0_i32_0 = arith.constant 0 : i32
    %c0_i32_1 = arith.constant 0 : i32
    %c0_i32_2 = arith.constant 0 : i32
    return %c0_i32, %c0_i32_0, %c0_i32_1 : i32, i32, i32
  }
  func.func @transform_8(%arg0: i32, %arg1: i32, %arg2: memref<2xi32, #tpu.memory_space<smem>>, %arg3: memref<2xi32, #tpu.memory_space<smem>>) -> (i32, i32, i32) {
    %c0_i32 = arith.constant 0 : i32
    %c0_i32_0 = arith.constant 0 : i32
    %c0_i32_1 = arith.constant 0 : i32
    %c0_i32_2 = arith.constant 0 : i32
    return %c0_i32, %c0_i32_0, %c0_i32_1 : i32, i32, i32
  }
  func.func @transform_9(%arg0: i32, %arg1: i32, %arg2: memref<2xi32, #tpu.memory_space<smem>>, %arg3: memref<2xi32, #tpu.memory_space<smem>>) -> (i32, i32, i32) {
    %c0_i32 = arith.constant 0 : i32
    %c0_i32_0 = arith.constant 0 : i32
    %c0_i32_1 = arith.constant 0 : i32
    %c0_i32_2 = arith.constant 0 : i32
    return %c0_i32, %c0_i32_0, %c0_i32_1 : i32, i32, i32
  }
  func.func @transform_10(%arg0: i32, %arg1: i32, %arg2: memref<2xi32, #tpu.memory_space<smem>>, %arg3: memref<2xi32, #tpu.memory_space<smem>>) -> (i32, i32, i32) {
    %c0_i32 = arith.constant 0 : i32
    %c0_i32_0 = arith.constant 0 : i32
    %c0_i32_1 = arith.constant 0 : i32
    %c0_i32_2 = arith.constant 0 : i32
    return %c0_i32, %c0_i32_0, %c0_i32_1 : i32, i32, i32
  }
  func.func @transform_11(%arg0: i32, %arg1: i32, %arg2: memref<2xi32, #tpu.memory_space<smem>>, %arg3: memref<2xi32, #tpu.memory_space<smem>>) -> (i32, i32, i32) {
    %c0_i32 = arith.constant 0 : i32
    %c0_i32_0 = arith.constant 0 : i32
    %c0_i32_1 = arith.constant 0 : i32
    %c0_i32_2 = arith.constant 0 : i32
    return %c0_i32, %c0_i32_0, %c0_i32_1 : i32, i32, i32
  }
  func.func @transform_12(%arg0: i32, %arg1: i32, %arg2: memref<2xi32, #tpu.memory_space<smem>>, %arg3: memref<2xi32, #tpu.memory_space<smem>>) -> (i32, i32) {
    %c0_i32 = arith.constant 0 : i32
    %c0_i32_0 = arith.constant 0 : i32
    %c0_i32_1 = arith.constant 0 : i32
    return %c0_i32, %c0_i32_0 : i32, i32
  }
  func.func @transform_13(%arg0: i32, %arg1: i32, %arg2: memref<2xi32, #tpu.memory_space<smem>>, %arg3: memref<2xi32, #tpu.memory_space<smem>>) -> (i32, i32) {
    %c0_i32 = arith.constant 0 : i32
    %c0_i32_0 = arith.constant 0 : i32
    %c0_i32_1 = arith.constant 0 : i32
    return %c0_i32, %c0_i32_0 : i32, i32
  }
  func.func @transform_14(%arg0: i32, %arg1: i32, %arg2: memref<2xi32, #tpu.memory_space<smem>>, %arg3: memref<2xi32, #tpu.memory_space<smem>>) -> (i32, i32, i32) {
    %c0_i32 = arith.constant 0 : i32
    %c0_i32_0 = arith.constant 0 : i32
    return %arg0, %arg1, %c0_i32 : i32, i32, i32
  }
  func.func @transform_15(%arg0: i32, %arg1: i32, %arg2: memref<2xi32, #tpu.memory_space<smem>>, %arg3: memref<2xi32, #tpu.memory_space<smem>>) -> (i32, i32, i32) {
    %c0_i32 = arith.constant 0 : i32
    %c0_i32_0 = arith.constant 0 : i32
    return %arg0, %arg1, %c0_i32 : i32, i32, i32
  }
}

</mosaic_0001>

<bundles_post_ra>
// kernel: tpu_custom_call.1
= control target key start
LH: loop header
LB: loop body
LE: loop exit
PB: predicated region body
PF: predicated region fallthrough
CT: control target
= control target key end

     0   :  { %s2954_s0 = inlined_call_operand.vmem [shape: s32[2], index: 0, kind: input, shape index: {}]   ;;  %s2955_s2 = inlined_call_operand.vmem [shape: f32[2,16,16], index: 2, kind: input, shape index: {}]   ;;  %s2956_s3 = inlined_call_operand.hbm [shape: f32[2,16,16], index: 3, kind: input, shape index: {}]   ;;  %s2957_s4 = inlined_call_operand.vmem [shape: f32[2,16,8], index: 4, kind: input, shape index: {}]   ;;  %s2958_s5 = inlined_call_operand.vmem [shape: bf16[5,16,32], index: 5, kind: input, shape index: {}]   ;;  %s2959_s6 = inlined_call_operand.hbm [shape: f32[1,32], index: 6, kind: input, shape index: {}]   ;;  %s2960_s7 = inlined_call_operand.hbm [shape: f32[1,32], index: 7, kind: input, shape index: {}]   ;;  %s2961_s8 = inlined_call_operand.hbm [shape: bf16[2,32,32], index: 8, kind: input, shape index: {}]   ;;  %s2962_s9 = inlined_call_operand.vmem [shape: bf16[2,32,32], index: 9, kind: input, shape index: {}]   ;;  %s2963_s10 = inlined_call_operand.hbm [shape: f32[2,1,32], index: 10, kind: input, shape index: {}]   ;;  %s2964_s11 = inlined_call_operand.hbm [shape: f32[2,1,32], index: 11, kind: input, shape index: {}]   ;;  %s2965_s12 = inlined_call_operand.vmem [shape: f32[2,1,32], index: 12, kind: input, shape index: {}]   ;;  %s2966_s13 = inlined_call_operand.vmem [shape: f32[2,1,32], index: 13, kind: input, shape index: {}]   ;;  %s2967_s14 = inlined_call_operand.vmem [shape: bf16[32,16], index: 14, kind: input, shape index: {}]   ;;  %s2968_s15 = inlined_call_operand.vmem [shape: f32[1,16], index: 15, kind: input, shape index: {}]   ;;  %s2969_s16 = inlined_call_operand.vmem [shape: bf16[2,32,16], index: 16, kind: output, shape index: {0}]   ;;  %s2970_s17 = inlined_call_operand.vmem [shape: bf16[2,32,16], index: 17, kind: output, shape index: {1}]   ;;  %s2971_s1 = inlined_call_operand.hbm [shape: s32[2], index: 1, kind: input, shape index: {}]  }
   0x1   :  { %2979 = sst [smem:[#allocation20_spill]] %s2954_s0 }
   0x2   :  { %2980 = sst [smem:[#allocation21_spill]] %s2955_s2  ;;  %s2991_s26 = sld [smem:[#allocation20_spill]] }
   0x3   :  { %2981 = sst [smem:[#allocation22_spill]] %s2957_s4 }
   0x4   :  { %2982 = sst [smem:[#allocation23_spill]] %s2959_s6 }
   0x5   :  { %2983 = sst [smem:[#allocation24_spill]] %s2960_s7 }
   0x6   :  { %2984 = sst [smem:[#allocation25_spill]] %s2962_s9 }
   0x7   :  { %2985 = sst [smem:[#allocation26_spill]] %s2965_s12 }
   0x8   :  { %2986 = sst [smem:[#allocation27_spill]] %s2966_s13  ;;  %s23_s4 = sshll.u32 %s2991_s26, 4  ;;  %s24_s4 = int_to_ptr.vmem [resolvable:$true] %s23_s4 }
   0x9   :  { %2987 = sst [smem:[#allocation28_spill]] %s2967_s14  ;;  %s2149_s27 = scalar_lea.vmem %s24_s4, 16 }
   0xa   :  { %2988 = sst [smem:[#allocation29_spill]] %s2968_s15  ;;  %p2150_p0 = scmp.ne.s32.totalorder %s24_s4, %s2149_s27 }
   0xb   :  { %2989 = sst [smem:[#allocation30_spill]] %s2969_s16  ;;  %p2154_p1 = scmp.lt.s32.totalorder %s24_s4, %s24_s4 }
   0xc   :  { %2990 = sst [smem:[#allocation31_spill]] %s2970_s17  ;;  %p2155_p2 = scmp.lt.s32.totalorder %s2149_s27, %s2149_s27 }
   0xe   :  { %p2156_p3 = por %p2155_p2, %p2154_p1 }
  0x10   :  { %p2157_p4 = pnand %p2156_p3, %p2150_p0 }
  0x12   :  { %2160 = shalt.err (!%p2157_p4)  }
  0x13   :  { %s2423_s28 = smov [#allocation3]   ;;  %s2161_s30 = scalar_lea.hbm %s2971_s1, 16 }
  0x14   :  { %26 = dma.vmem_to_smem %s24_s4, 16, %s2423_s28, [#allocation2] }
  0x15   :  { %p2162_p5 = scmp.ne.s32.totalorder %s2971_s1, %s2161_s30  ;;  %p2165_p6 = scmp.lt.u32.totalorder %s2161_s30, %s2971_s1 }
  0x17   :  { %p2167_p7 = pnand %p2165_p6, %p2162_p5 }
  0x19   :  { %2170 = shalt.err (!%p2167_p7)  }
  0x1a   :  { %s2424_s21 = smov [#allocation4]  }
  0x1b   :  { %28 = dma.hbm_to_smem %s2971_s1, 16, %s2424_s21, [#allocation2] }
  0x1c   :  { %2373 = dma.done.wait [#allocation2], 32 }
  0x1d   :  { %2374 = vsyncadd [#allocation2], 4294967264 }
  0x1e   :  { %30 = sfence }
  0x1f   :  { %31 = vsyncpa [#allocation6], 0 }
  0x20   :  { %33 = vsyncpa [#allocation6 + $0x1], 0 }
  0x21   :  { %34 = vsyncpa [#allocation8], 0 }
  0x22   :  { %35 = vsyncpa [#allocation11], 0 }
  0x23   :  { %36 = vsyncpa [#allocation14], 0  ;;  %s2544_s4 = smov 0   ;;  %s2546_s24 = smov 0  }
  0x24   :  { %s2548_s25 = smov 0   ;;  %s2550_s26 = smov 0  }
  0x25   :  { %s2552_s27 = smov 0   ;;  %s2554_s28 = smov 0  }
  0x26   :  { %s2556_s1 = smov 0   ;;  %s2558_s29 = smov 0  }
  0x27 LB: > { %s1772_s0 = sadd.s32 4294967295, %s2421_s29   ;;  %p1774_p8 = scmp.ge.s32.totalorder %s2421_s29, 1  ;;  %s2421_s29 = sphi %s2558_s29, %s42_s29   ;;  %s2417_s1 = sphi %s2556_s1, %s3018_s1   ;;  %s2413_s28 = sphi %s2554_s28, %s3017_s28   ;;  %s2409_s27 = sphi %s2552_s27, %s3016_s27   ;;  %s2405_s26 = sphi %s2550_s26, %s3015_s26   ;;  %s2401_s25 = sphi %s2548_s25, %s3014_s25   ;;  %s2397_s24 = sphi %s2546_s24, %s3013_s24   ;;  %s2393_s4 = sphi %s2544_s4, %s3012_s4  }
  0x28   : > { %p2586_p9 = scmp.eq.s32.totalorder %s1772_s0, 0  ;;  %p424_p10 = scmp.lt.s32.totalorder %s2421_s29, 5 }
  0x29   : > { %s2425_s19 = smov [#allocation7]   ;;  %s2426_s20 = smov [#allocation10]  }
  0x2a   : > { %s2992_s30 = scalar_select %p2586_p9, 1, 0 }
  0x2b   : > { %p2591_p11 = pnand %p1774_p8, %p424_p10  ;;  %s440_s2 = sshll.u32 %s2425_s19, 4  ;;  %s441_s2 = int_to_ptr.vmem [resolvable:$true] %s440_s2 }
  0x2c   : > { %s461_s21 = sshll.u32 %s2426_s20, 4  ;;  %s2427_s23 = smov [#allocation9]   ;;  %s2603_s21 = int_to_ptr.vmem [resolvable:$true] %s461_s21 }
  0x2d   : > { %s2993_s18 = scalar_select %p2591_p11, 1, 0 }
  0x2e   : > { %p2024_p12 = pneg %p2591_p11  ;;  %s2605_s0 = sshll.u32 %s2427_s23, 4  ;;  %s452_s0 = int_to_ptr.vmem [resolvable:$true] %s2605_s0 }
  0x2f   : > { %s2995_s6 = sld [smem:[#allocation23_spill]] }
  0x30   : > { %p2599_p13 = pnand %p2024_p12, %p2586_p9 }
  0x32   : > { %p2615_p1 = pneg %p2599_p13 }
  0x35   : > { %s2171_s19 = scalar_lea.hbm %s2995_s6, 16 }
  0x36   : > { %p2172_p0 = scmp.ne.s32.totalorder %s2995_s6, %s2171_s19  ;;  %p2178_p4 = scmp.lt.u32.totalorder %s2171_s19, %s2995_s6 }
  0x38   : > { %p2174_p2 = pnand %p2615_p1, %p2172_p0 }
  0x3a   : > { %p2175_p3 = pneg %p2174_p2 }
  0x3c   : > { %p2180_p5 = pnand %p2178_p4, %p2175_p3 }
  0x3e   : > { %2183 = shalt.err (!%p2180_p5)
}
  0x3f   : > { %s2184_s15 = scalar_lea.vmem %s441_s2, 16  ;;  %s2191_s13 = scalar_lea.vmem %s441_s2, 32 }
  0x40   : > { %p2185_p6 = scmp.ne.s32.totalorder %s441_s2, %s2184_s15  ;;  %p2192_p10 = scmp.lt.s32.totalorder %s441_s2, %s441_s2 }
  0x41   : > { %p2193_p12 = scmp.lt.s32.totalorder %s2191_s13, %s2184_s15 }
  0x42   : > { %p2187_p7 = pnand %p2185_p6, %p2615_p1 }
  0x43   : > { %p2194_p11 = por %p2193_p12, %p2192_p10 }
  0x44   : > { %p2188_p8 = pneg %p2187_p7 }
  0x46   : > { %p2195_p9 = pnand %p2194_p11, %p2188_p8 }
  0x48   : > { %2198 = shalt.err (!%p2195_p9)
}
  0x49   : > { %2027 = dma.hbm_to_vmem [thread:$0]  (!%p2599_p13), %s2995_s6, 16, %s441_s2, [#allocation8]  }
  0x4a   : > { %s2199_s23 = scalar_lea.hbm %s2961_s8, 512 }
  0x4b   : > { %p2200_p0 = scmp.ne.s32.totalorder %s2961_s8, %s2199_s23  ;;  %p2206_p9 = scmp.lt.u32.totalorder %s2199_s23, %s2961_s8 }
  0x4d   : > { %p2202_p2 = pnand %p2200_p0, %p2615_p1 }
  0x4f   : > { %p2203_p3 = pneg %p2202_p2 }
  0x51   : > { %p2208_p11 = pnand %p2206_p9, %p2203_p3 }
  0x53   : > { %2211 = shalt.err (!%p2208_p11)
}
  0x54   : > { %s2212_s2 = scalar_lea.vmem %s2603_s21, 512  ;;  %p2220_p7 = scmp.lt.s32.totalorder %s2603_s21, %s2603_s21 }
  0x55   : > { %p2213_p4 = scmp.ne.s32.totalorder %s2603_s21, %s2212_s2  ;;  %p2221_p8 = scmp.lt.s32.totalorder %s2212_s2, %s2212_s2 }
  0x57   : > { %p2215_p5 = pnand %p2213_p4, %p2615_p1  ;;  %p2222_p10 = por %p2221_p8, %p2220_p7 }
  0x59   : > { %p2216_p6 = pneg %p2215_p5 }
  0x5b   : > { %p2223_p12 = pnand %p2222_p10, %p2216_p6 }
  0x5d   : > { %2226 = shalt.err (!%p2223_p12)
}
  0x5e   : > { %s2428_s9 = smov 64   ;;  %s2429_s16 = smov 4  }
  0x5f   : > { %2033 = dma.hbm_to_vmem [thread:$0]  (!%p2599_p13), %s2961_s8, 512, %s2603_s21, [#allocation11], %s2428_s9, %s2428_s9, %s2429_s16  }
  0x60   : > { %s2997_s7 = sld [smem:[#allocation24_spill]] }
  0x66   : > { %s2227_s23 = scalar_lea.hbm %s2997_s7, 16 }
  0x67   : > { %p2228_p0 = scmp.ne.s32.totalorder %s2997_s7, %s2227_s23  ;;  %p2234_p9 = scmp.lt.u32.totalorder %s2227_s23, %s2997_s7 }
  0x69   : > { %p2230_p2 = pnand %p2228_p0, %p2615_p1 }
  0x6b   : > { %p2231_p3 = pneg %p2230_p2 }
  0x6d   : > { %p2236_p11 = pnand %p2234_p9, %p2231_p3 }
  0x6f   : > { %2239 = shalt.err (!%p2236_p11)
}
  0x70   : > { %s2240_s14 = scalar_lea.vmem %s452_s0, 16  ;;  %s2247_s21 = scalar_lea.vmem %s452_s0, 32 }
  0x71   : > { %p2241_p4 = scmp.ne.s32.totalorder %s452_s0, %s2240_s14  ;;  %p2248_p7 = scmp.lt.s32.totalorder %s452_s0, %s452_s0 }
  0x72   : > { %p2249_p8 = scmp.lt.s32.totalorder %s2247_s21, %s2240_s14 }
  0x73   : > { %p2243_p5 = pnand %p2241_p4, %p2615_p1 }
  0x74   : > { %p2250_p10 = por %p2249_p8, %p2248_p7 }
  0x75   : > { %p2244_p6 = pneg %p2243_p5 }
  0x77   : > { %p2251_p12 = pnand %p2250_p10, %p2244_p6 }
  0x79   : > { %2254 = shalt.err (!%p2251_p12)
}
  0x7a   : > { %2030 = dma.hbm_to_vmem [thread:$0]  (!%p2599_p13), %s2997_s7, 16, %s452_s0, [#allocation8]  }
  0x7b   : > { %s2430_s6 = smov [#allocation12]   ;;  %s2255_s23 = scalar_lea.hbm %s2963_s10, 32 }
  0x7c   : > { %s477_s17 = sshll.u32 %s2430_s6, 4  ;;  %p2256_p0 = scmp.ne.s32.totalorder %s2963_s10, %s2255_s23  ;;  %s478_s17 = int_to_ptr.vmem [resolvable:$true] %s477_s17 }
  0x7d   : > { %p2262_p9 = scmp.lt.u32.totalorder %s2255_s23, %s2963_s10 }
  0x7e   : > { %p2258_p2 = pnand %p2256_p0, %p2615_p1 }
  0x80   : > { %p2259_p3 = pneg %p2258_p2 }
  0x82   : > { %p2264_p11 = pnand %p2262_p9, %p2259_p3 }
  0x84   : > { %2267 = shalt.err (!%p2264_p11)
}
  0x85   : > { %s2268_s0 = scalar_lea.vmem %s478_s17, 32  ;;  %p2276_p7 = scmp.lt.s32.totalorder %s478_s17, %s478_s17 }
  0x86   : > { %p2269_p4 = scmp.ne.s32.totalorder %s478_s17, %s2268_s0  ;;  %p2277_p8 = scmp.lt.s32.totalorder %s2268_s0, %s2268_s0 }
  0x88   : > { %p2271_p5 = pnand %p2269_p4, %p2615_p1  ;;  %p2278_p10 = por %p2277_p8, %p2276_p7 }
  0x8a   : > { %p2272_p6 = pneg %p2271_p5 }
  0x8c   : > { %p2279_p12 = pnand %p2278_p10, %p2272_p6 }
  0x8e   : > { %2282 = shalt.err (!%p2279_p12)
}
  0x8f   : > { %s2431_s21 = smov 16   ;;  %s2432_s9 = smov 1  }
  0x90   : > { %2036 = dma.hbm_to_vmem [thread:$0]  (!%p2599_p13), %s2963_s10, 32, %s478_s17, [#allocation11], %s2431_s21, %s2431_s21, %s2432_s9  }
  0x91   : > { %s2433_s12 = smov [#allocation13]   ;;  %s2283_s13 = scalar_lea.hbm %s2964_s11, 32 }
  0x92   : > { %s490_s19 = sshll.u32 %s2433_s12, 4  ;;  %p2284_p0 = scmp.ne.s32.totalorder %s2964_s11, %s2283_s13  ;;  %s491_s19 = int_to_ptr.vmem [resolvable:$true] %s490_s19 }
  0x93   : > { %p2290_p9 = scmp.lt.u32.totalorder %s2283_s13, %s2964_s11 }
  0x94   : > { %p2286_p2 = pnand %p2284_p0, %p2615_p1 }
  0x96   : > { %p2287_p3 = pneg %p2286_p2 }
  0x98   : > { %p2292_p11 = pnand %p2290_p9, %p2287_p3 }
  0x9a   : > { %2295 = shalt.err (!%p2292_p11)
}
  0x9b   : > { %s2296_s17 = scalar_lea.vmem %s491_s19, 32  ;;  %p2304_p7 = scmp.lt.s32.totalorder %s491_s19, %s491_s19 }
  0x9c   : > { %p2297_p4 = scmp.ne.s32.totalorder %s491_s19, %s2296_s17  ;;  %p2305_p8 = scmp.lt.s32.totalorder %s2296_s17, %s2296_s17 }
  0x9e   : > { %p2299_p5 = pnand %p2297_p4, %p2615_p1  ;;  %p2306_p10 = por %p2305_p8, %p2304_p7 }
  0xa0   : > { %p2300_p6 = pneg %p2299_p5 }
  0xa2   : > { %p2307_p12 = pnand %p2306_p10, %p2300_p6 }
  0xa4   : > { %2310 = shalt.err (!%p2307_p12)
}
  0xa5   : > { %2039 = dma.hbm_to_vmem [thread:$0]  (!%p2599_p13), %s2964_s11, 32, %s491_s19, [#allocation14], %s2431_s21, %s2431_s21, %s2432_s9  }
  0xa6   : > { %s51_s7 = sadd.s32 1, %s2413_s28  ;;  %s54_s22 = sadd.s32 1, %s2417_s1 }
  0xa7   : > { %p52_p1 = scmp.ge.s32.totalorder %s51_s7, 2  ;;  %s87_s20 = sadd.s32 1, %s2401_s25 }
  0xa8   : > { %p94_p0 = scmp.ne.s32.totalorder %s2401_s25, %s2397_s24  ;;  %p95_p2 = scmp.eq.s32.totalorder %s2421_s29, 0 }
  0xa9   : > { %s3020_s7 = smov (%p52_p1, %s51_s7), 0  ;;  %s3022_s22 = smov (!%p52_p1, %s54_s22), %s2417_s1 }
  0xaa   : > { %s84_s12 = ssub.s32 %s2413_s28, %s3020_s7  ;;  %p56_p3 = scmp.ge.s32.totalorder %s3022_s22, 2 }
  0xab   : > { %p85_p9 = scmp.eq.s32.totalorder %s84_s12, 0  ;;  %p96_p11 = por %p95_p2, %p94_p0 }
  0xac   : > { %p100_p4 = scmp.ne.s32.totalorder %s2397_s24, %s2393_s4  ;;  %s3024_s22 = smov (%p56_p3, %s3022_s22), 0 }
  0xad   : > { %s2725_s21 = scalar_select %p85_p9, %s2401_s25, %s87_s20  }
  0xae   : > { %p2998_p13 = scmp.ne.s32.totalorder %s2992_s30, 0  ;;  %p2049_p6 = scmp.lt.s32.totalorder %s2421_s29, 4 }
  0xaf   : > { %s524_s19 = sand.u32 1, %s2401_s25   ;;  %s1861_s23 = sshll.u32 %s2413_s28, 8 }
  0xb0   : > { %p2729_p5 = por %p2998_p13, %p100_p4  ;;  %s1781_s15 = sshll.u32 %s524_s19, 4 }
  0xb1   : > { %s2739_s14 = scalar_lea.hbm %s2956_s3, %s1861_s23  ;;  %s528_s4 = scalar_lea.vmem [#allocation5], %s1781_s15 }
  0xb2   : > { %s535_s0 = sshll.u32 %s528_s4, 4  ;;  %p2741_p7 = pnand %p2049_p6, %p96_p11  ;;  %s2745_s0 = int_to_ptr.vmem [resolvable:$true] %s535_s0 }
  0xb3   : > { %s2747_s16 = scalar_lea.sflag [#allocation6], %s524_s19  ;;  %s2311_s6 = scalar_lea.hbm %s2739_s14, 256 }
  0xb4   : > { %p2312_p8 = scmp.ne.s32.totalorder %s2739_s14, %s2311_s6  ;;  %p2313_p10 = pneg %p2741_p7 }
  0xb5   : > { %s2316_s23 = scalar_lea.hbm %s2956_s3, 512  ;;  %p2317_p0 = scmp.lt.u32.totalorder %s2739_s14, %s2956_s3 }
  0xb6   : > { %p2314_p12 = pnand %p2313_p10, %p2312_p8  ;;  %p2318_p2 = scmp.lt.u32.totalorder %s2316_s23, %s2311_s6 }
  0xb7   : > { %p2320_p9 = scmp.lt.u32.totalorder %s2311_s6, %s2739_s14 }
  0xb8   : > { %p2315_p1 = pneg %p2314_p12  ;;  %p2319_p3 = por %p2318_p2, %p2317_p0 }
  0xba   : > { %p2321_p11 = por %p2320_p9, %p2319_p3 }
  0xbc   : > { %p2322_p4 = pnand %p2321_p11, %p2315_p1 }
  0xbe   : > { %2325 = shalt.err (!%p2322_p4)
}
  0xbf   : > { %s2326_s19 = scalar_lea.vmem %s2745_s0, 256  ;;  %s2434_s2 = smov [#allocation5]  }
  0xc0   : > { %p2327_p13 = scmp.ne.s32.totalorder %s2745_s0, %s2326_s19  ;;  %s2331_s4 = sshll.u32 %s2434_s2, 4  ;;  %s2332_s4 = int_to_ptr.vmem [resolvable:$false] %s2331_s4 }
  0xc1   : > { %s2333_s20 = scalar_lea.vmem %s2332_s4, 512  ;;  %p2334_p12 = scmp.lt.s32.totalorder %s2745_s0, %s2332_s4 }
  0xc2   : > { %p2329_p6 = pnand %p2327_p13, %p2313_p10  ;;  %p2335_p0 = scmp.lt.s32.totalorder %s2333_s20, %s2326_s19 }
  0xc4   : > { %p2330_p8 = pneg %p2329_p6  ;;  %p2336_p2 = por %p2335_p0, %p2334_p12 }
  0xc6   : > { %p2337_p3 = pnand %p2336_p2, %p2330_p8 }
  0xc8   : > { %2340 = shalt.err (!%p2337_p3)
}
  0xc9   : > { %s2435_s6 = smov 128   ;;  %s2436_s12 = smov 8  }
  0xca   : > { %2043 = dma.hbm_to_vmem [thread:$0]  (!%p2741_p7), %s2739_s14, 256, %s2745_s0, %s2747_s16, %s2435_s6, %s2435_s6, %s2436_s12  }
  0xcb   : > { %p3001_p10 = scmp.ne.s32.totalorder %s2993_s18, 0 }
  0xcc   : > { %s557_s23 = sand.u32 (!%p3001_p10), 1, %s2397_s24  }
  0xcd   : > { %555 = sbr.rel (%p3001_p10) target bundleno = 1819 (0x71b), region = 76  ;;  %s2778_s15 = sshll.u32 (!%p3001_p10), %s557_s23, 4 }
  0xce   : > { %s558_s13 = scalar_lea.sflag (!%p3001_p10), [#allocation6], %s557_s23  ;;  %s561_s19 = scalar_lea.vmem (!%p3001_p10), [#allocation5], %s2778_s15 }
  0xd4   : > { %2376 = dma.done.wait (%p2729_p5), %s558_s13, 256  }
  0xd5   : > { %2378 = vsyncadd (%p2729_p5), %s558_s13, 4294967040  ;;  %p3002_p1 = scmp.ne.s32.totalorder %s2992_s30, 0 }
  0xd7   : > { %2380 = dma.done.wait (%p3002_p1), [#allocation8], 32  }
  0xd8   : > { %2382 = vsyncadd (%p3002_p1), [#allocation8], 4294967264 }
  0xd9   : > { %2384 = dma.done.wait (%p3002_p1), [#allocation11], 544  }
  0xda   : > { %2386 = vsyncadd (%p3002_p1), [#allocation11], 4294966752 }
  0xdb   : > { %2388 = dma.done.wait (%p3002_p1), [#allocation14], 32  }
  0xdc   : > { %2390 = vsyncadd (%p3002_p1), [#allocation14], 4294967264  ;;  %p651_p5 = scmp.lt.s32.totalorder %s2409_s27, 1  ;;  %v2437_v0 = vmov 0.0   ;;  %vm2438_vm0 = vmmov 0   ;;  %s781_s18 = sld [smem:[#allocation4 + %s2405_s26]] }
  0xdd   : > { %1907 = vmatprep.subr.bf16.mxu1 %v2437_v0  ;;  %1909 = vmatprep.mubr.msk.bf16.mxu1 %vm2438_vm0, %v2437_v0  ;;  %s682_s9 = sld [smem:[#allocation3 + %s2405_s26]]  ;;  %v2134_v1 = vld [vmem:[%s2958_s5 + $0x8] sm:$0xff]   ;;  %v2135_v7 = vld [vmem:[%s2958_s5] sm:$0xff]   ;;  %vm688_vm1 = vcmask 130048   ;;  %v2136_v14 = vld [vmem:[%s2958_s5 + $0x10] sm:$0xff]   ;;  %vm1094_vm2 = vcmask 261120  }
  0xde   : > { %s3026_s27 = smov (!%p651_p5, %s2409_s27), 1  ;;  %s3003_s17 = sld [smem:[#allocation21_spill]]  ;;  %1908 = vmatpush3.bf16.msra.mxu1 %v2134_v1  ;;  %v686_v11 = vld [vmem:[%s561_s19] sm:$0xff]  ;;  %v2137_v16 = vld [vmem:[%s2958_s5 + $0x18] sm:$0xff]   ;;  %vm778_vm3 = vcmask 125952   ;;  %vm1461_vm4 = vcmask 64512  }
  0xdf   : > { %s1862_s14 = sshll.u32 %s3026_s27, 4  ;;  %1913 = vmatprep.subr.bf16.mxu1 %v2437_v0  ;;  %1904 = vmatprep.mubr.msk.f32.mxu0 %vm688_vm1, %v686_v11  ;;  %v2138_v20 = vld [vmem:[%s2958_s5 + $0x20] sm:$0xff]   ;;  %v687_v22 = vld [vmem:[%s561_s19 + $0x8] sm:$0xff]  ;;  %s1795_s15 = sshll.u32 %s2405_s26, 1 }
  0xe0   : > { %v2139_v23 = vld [vmem:[#allocation10] sm:$0xff]   ;;  %v2140_v24 = vld [vmem:[#allocation10 + $0x8] sm:$0xff]   ;;  %v1823_v25 = vld [vmem:[#allocation7] ss:$0 sm:$0xff]  ;;  %p664_p7 = scmp.lt.s32.totalorder %s1795_s15, 3  ;;  %s1796_s19 = sshll.u32 %s3026_s27, 2 }
  0xe1   : > { %v1824_v27 = vld [vmem:[#allocation9] ss:$0 sm:$0xff]  ;;  %s3005_s23 = sld [smem:[#allocation25_spill]]  ;;  %v1828_v41 = vld [vmem:[#allocation12] ss:$0 sm:$0xff]  ;;  %v2143_v51 = vld [vmem:[#allocation10 + $0x10] sm:$0xff]  }
  0xe2   : > { %s3028_s15 = smov (!%p664_p7, %s1795_s15), 3  ;;  %v1829_v43 = vld [vmem:[#allocation13] ss:$0 sm:$0xff]  ;;  %v2144_v52 = vld [vmem:[#allocation10 + $0x18] sm:$0xff]   ;;  %s3006_s30 = sld [smem:[#allocation26_spill]] }
  0xe3   : > { %s3008_s13 = sld [smem:[#allocation28_spill]]  ;;  %p656_p9 = scmp.lt.s32.totalorder %s2405_s26, 1 }
  0xe4   : > { %s655_s16 = scalar_lea.vmem %s3003_s17, %s1862_s14  ;;  %s2858_s17 = sadd.s32 %s1796_s19, %s3028_s15 }
  0xe5   : > { %s782_s20 = scalar_lea.vmem %s655_s16, %s781_s18  ;;  %s683_s6 = scalar_lea.vmem %s655_s16, %s682_s9 }
  0xe6   : > { %v783_v2 = vld [vmem:[%s782_s20] sm:$0xff]  ;;  %v784_v3 = vld [vmem:[%s782_s20 + $0x8] sm:$0xf]  ;;  %s1797_s16 = sshll.u32 %s2858_s17, 2  ;;  %s3004_s20 = sld [smem:[#allocation30_spill]] }
  0xe7   : > { %v785_v4 = vpack.c.bf16 %v784_v3, %v783_v2  ;;  %v684_v9 = vld [vmem:[%s683_s6] sm:$0xff]  ;;  %v685_v10 = vld [vmem:[%s683_s6 + $0x8] sm:$0xff]  ;;  %s3007_s19 = sld [smem:[#allocation27_spill]]  ;;  %v2145_v63 = vld [vmem:[%s3005_s23 + $0x10] sm:$0xff]   ;;  %s3030_s26 = smov (!%p656_p9, %s2405_s26), 1 }
  0xe8   : > { %v1982_v12 = vpack.c.bf16 %v685_v10, %v684_v9  ;;  %v2141_v39 = vld [vmem:[%s3005_s23] sm:$0xff]   ;;  %v2142_v40 = vld [vmem:[%s3005_s23 + $0x8] sm:$0xff]   ;;  %v2146_v1 = vld [vmem:[%s3005_s23 + $0x18] sm:$0xff]   ;;  %s1863_s4 = sshll.u32 %s3030_s26, 4  ;;  %s3009_s27 = sld [smem:[#allocation22_spill]] }
  0xe9   : > { %v792_v5 = vshrl.u32 %v785_v4, 16  ;;  %v794_v6 = vshll.u32 %v785_v4, 16  ;;  %v899_v15 = vrot.slane %v785_v4, 1  ;;  %v1009_v21 = vrot.slane %v785_v4, 2  ;;  %v1833_v53 = vld [vmem:[%s3006_s30] ss:$0 sm:$0xff] }
  0xea   : > { %1983 = vmatprep.subr.bf16.mxu0 %v1982_v12  ;;  %v1838_v2 = vld [vmem:[#allocation12 + $0x1] ss:$0 sm:$0xff]  ;;  %s3010_s14 = sld [smem:[#allocation29_spill]]  ;;  %s3011_s15 = sld [smem:[#allocation31_spill]] }
  0xeb   : > { %v796_v8 = vrot.slane %v794_v6, 1  ;;  %1985 = vmatpush3.bf16.msra.mxu0 %v1982_v12  ;;  %v953_v17 = vrot.slane %v792_v5, 1  ;;  %v954_v18 = vrot.slane %v794_v6, 2  ;;  %v2147_v12 = vld [vmem:[%s3008_s13] sm:$0xff]  }
  0xec   : > { %1937 = vmatprep.subr.bf16.mxu0 %v2437_v0  ;;  %s669_s6 = scalar_lea.vmem %s3004_s20, %s1797_s16 }
  0xed   : > { %v797_v13 = vor.u32 %v796_v8, %v792_v5  ;;  %v955_v19 = vor.u32 %v954_v18, %v953_v17  ;;  %v1834_v55 = vld [vmem:[%s3007_s19] ss:$0 sm:$0xff] }
  0xee   : > { %1905 = vmatmul.mubr.msk.f32.vlgmr.msra.gmra.mrb[0].mxu0 %vm688_vm1, %v687_v22  ;;  %s660_s12 = scalar_lea.vmem %s3009_s27, %s1863_s4 }
  0xef   : > { %1910 = vmatmul.mubr.msk.bf16.vlgmr.msra.gmra.mrb[0].mxu1 %vm688_vm1, %v797_v13  ;;  %1938 = vmatpush3.bf16.msra.mxu0 %v2139_v23  ;;  %v2148_v13 = vld [vmem:[%s3008_s13 + $0x8] sm:$0xff]   ;;  %v1459_v23 = vld [vmem:[%s660_s12] sm:$0xff] }
  0xf0   : > { %1914 = vmatpush3.bf16.msra.mxu1 %v2135_v7  ;;  %1915 = vmatprep.mubr.msk.bf16.mxu1 %vm2438_vm0, %v2437_v0  ;;  %s679_s2 = scalar_lea.vmem %s3011_s15, %s1797_s16 }
  0xf1   : > { %1919 = vmatprep.subr.bf16.mxu1 %v2437_v0  ;;  %1941 = vmatprep.mubr.msk.bf16.mxu0 %vm2438_vm0, %v2437_v0 }
  0xf2   : > { %1939 = vmatprep.subr.bf16.mxu0 %v2437_v0 }
  0xf3   : > { %1940 = vmatpush3.bf16.msra.mxu0 %v2140_v24  ;;  %v1851_v24 = vld [vmem:[%s3010_s14] ss:$0 sm:$0xff] }
  0xf4   : > { %1945 = vmatprep.subr.bf16.mxu0 %v2437_v0 }
  0xfb   : > { %1916 = vmatmul.mubr.msk.bf16.vlgmr.msra.gmra.mrb[0].mxu1 %vm688_vm1, %v785_v4  ;;  %v1839_v4 = vld [vmem:[#allocation13 + $0x1] ss:$0 sm:$0xff] }
  0xfc   : > { %1920 = vmatpush3.bf16.msra.mxu1 %v2136_v14  ;;  %1921 = vmatprep.mubr.msk.bf16.mxu1 %vm2438_vm0, %v2437_v0  ;;  %v1848_v14 = vld [vmem:[%s3006_s30 + $0x1] ss:$0 sm:$0xff] }
  0xfd   : > { %1925 = vmatprep.subr.bf16.mxu1 %v2437_v0 }
 0x107   : > { %1922 = vmatmul.mubr.msk.bf16.vlgmr.msra.gmra.mrb[0].mxu1 %vm688_vm1, %v899_v15 }
 0x108   : > { %1926 = vmatpush3.bf16.msra.mxu1 %v2137_v16  ;;  %1927 = vmatprep.mubr.msk.bf16.mxu1 %vm2438_vm0, %v2437_v0  ;;  %v1850_v16 = vld [vmem:[%s3007_s19 + $0x1] ss:$0 sm:$0xff] }
 0x109   : > { %1931 = vmatprep.subr.bf16.mxu1 %v2437_v0 }
 0x113   : > { %1928 = vmatmul.mubr.msk.bf16.vlgmr.msra.gmra.mrb[0].mxu1 %vm688_vm1, %v955_v19 }
 0x114   : > { %1932 = vmatpush3.bf16.msra.mxu1 %v2138_v20  ;;  %1933 = vmatprep.mubr.msk.bf16.mxu1 %vm2438_vm0, %v2437_v0 }
 0x11f   : > { %1934 = vmatmul.mubr.msk.bf16.vlgmr.msra.gmra.mrb[0].mxu1 %vm688_vm1, %v1009_v21 }
 0x120   : > { %1979 = vmatprep.mubr.msk.f32.mxu1 %vm1461_vm4, %v1459_v23 }
 0x1c1   : > { %v1906_v35 = vpop.f32.mrb[0].mxu0 }
 0x1c2   : > { %v1865_v36 = vpack.c.bf16 %v1906_v35, %v1906_v35  ;;  %v761_v37 = vpop.f32.mrb[1].mxu0 }
 0x1c3   : > { %v1864_v38 = vpack.c.bf16 %v761_v37, %v761_v37 }
 0x1c4   : > { %780 = vst.msk [vmem:[%s669_s6 + $0x4] sm:$0xf] %vm778_vm3, %v1865_v36 }
 0x1c5   : > { %779 = vst.msk [vmem:[%s669_s6] sm:$0xf] %vm778_vm3, %v1864_v38 }
 0x1f2   : > { %v1053_v26 = vpop.f32.mrb[0].mxu1 }
 0x1f3   : > { %v1067_v28 = vmul.f32 %v1823_v25, %v1053_v26  ;;  %v1935_v29 = vpop.f32.mrb[1].mxu1 }
 0x1f4   : > { %v1056_v30 = vpop.f32.mrb[2].mxu1  ;;  %v1460_v29 = vld [vmem:[%s660_s12 + $0x8] sm:$0xff] }
 0x1f5   : > { %v1075_v31 = vadd.f32 %v1824_v27, %v1067_v28  ;;  %v1936_v32 = vpop.f32.mrb[3].mxu1 }
 0x1f7   : > { %v1076_v33 = vmax.f32 %v1075_v31, 0.0 }
 0x1f9   : > { %v1077_v34 = vpack.c.bf16 %v1076_v33, %v1076_v33 }
 0x1fb   : > { %1942 = vmatmul.mubr.msk.bf16.vlgmr.msra.gmra.mrb[4].mxu0 %vm1094_vm2, %v1077_v34 }
 0x1fc   : > { %1949 = vmatprep.mubr.msk.bf16.mxu0 %vm2438_vm0, %v2437_v0  ;;  %1946 = vmatpush3.bf16.msra.mxu0 %v2141_v39 }
 0x1fd   : > { %1947 = vmatprep.subr.bf16.mxu0 %v2437_v0 }
 0x200   : > { %1948 = vmatpush3.bf16.msra.mxu0 %v2142_v40 }
 0x201   : > { %1953 = vmatprep.subr.bf16.mxu0 %v2437_v0 }
 0x2ce   : > { %v1132_v42 = vpop.f32.mrb[4].mxu0 }
 0x2cf   : > { %v1145_v44 = vmul.f32 %v1828_v41, %v1132_v42  ;;  %v1943_v45 = vpop.f32.mrb[5].mxu0 }
 0x2d0   : > { %v1135_v46 = vpop.f32.mrb[6].mxu0 }
 0x2d1   : > { %v1153_v47 = vadd.f32 %v1829_v43, %v1145_v44  ;;  %v1944_v48 = vpop.f32.mrb[7].mxu0 }
 0x2d3   : > { %v1154_v49 = vmax.f32 %v1153_v47, 0.0 }
 0x2d5   : > { %v1155_v50 = vpack.c.bf16 %v1154_v49, %v1154_v49 }
 0x2d7   : > { %1950 = vmatmul.mubr.msk.bf16.vlgmr.msra.gmra.mrb[8].mxu0 %vm1094_vm2, %v1155_v50 }
 0x2d8   : > { %1957 = vmatprep.mubr.msk.bf16.mxu0 %vm2438_vm0, %v2437_v0  ;;  %1954 = vmatpush3.bf16.msra.mxu0 %v2143_v51 }
 0x2d9   : > { %1955 = vmatprep.subr.bf16.mxu0 %v2437_v0 }
 0x2dc   : > { %1956 = vmatpush3.bf16.msra.mxu0 %v2144_v52 }
 0x2dd   : > { %1961 = vmatprep.subr.bf16.mxu0 %v2437_v0 }
 0x3aa   : > { %v1209_v54 = vpop.f32.mrb[8].mxu0 }
 0x3ab   : > { %v1222_v56 = vmul.f32 %v1833_v53, %v1209_v54  ;;  %v1951_v57 = vpop.f32.mrb[9].mxu0 }
 0x3ac   : > { %v1212_v58 = vpop.f32.mrb[10].mxu0 }
 0x3ad   : > { %v1230_v59 = vadd.f32 %v1834_v55, %v1222_v56  ;;  %v1952_v60 = vpop.f32.mrb[11].mxu0 }
 0x3af   : > { %v1231_v61 = vadd.f32 %v1230_v59, %v1076_v33 }
 0x3b1   : > { %v1232_v62 = vpack.c.bf16 %v1231_v61, %v1231_v61 }
 0x3b3   : > { %1958 = vmatmul.mubr.msk.bf16.vlgmr.msra.gmra.mrb[12].mxu0 %vm1094_vm2, %v1232_v62 }
 0x3b4   : > { %1965 = vmatprep.mubr.msk.bf16.mxu0 %vm2438_vm0, %v2437_v0  ;;  %1962 = vmatpush3.bf16.msra.mxu0 %v2145_v63 }
 0x3b5   : > { %1963 = vmatprep.subr.bf16.mxu0 %v2437_v0 }
 0x3b8   : > { %1964 = vmatpush3.bf16.msra.mxu0 %v2146_v1 }
 0x3b9   : > { %1969 = vmatprep.subr.bf16.mxu0 %v2437_v0 }
 0x486   : > { %v1287_v3 = vpop.f32.mrb[12].mxu0 }
 0x487   : > { %v1301_v5 = vmul.f32 %v1838_v2, %v1287_v3  ;;  %v1959_v6 = vpop.f32.mrb[13].mxu0 }
 0x488   : > { %v1290_v7 = vpop.f32.mrb[14].mxu0 }
 0x489   : > { %v1310_v8 = vadd.f32 %v1839_v4, %v1301_v5  ;;  %v1960_v9 = vpop.f32.mrb[15].mxu0 }
 0x48b   : > { %v1311_v10 = vmax.f32 %v1310_v8, 0.0 }
 0x48d   : > { %v1312_v11 = vpack.c.bf16 %v1311_v10, %v1311_v10 }
 0x48f   : > { %1966 = vmatmul.mubr.msk.bf16.vlgmr.msra.gmra.mrb[16].mxu0 %vm1094_vm2, %v1312_v11 }
 0x490   : > { %1973 = vmatprep.mubr.msk.bf16.mxu0 %vm2438_vm0, %v2437_v0  ;;  %1970 = vmatpush3.bf16.msra.mxu0 %v2147_v12 }
 0x491   : > { %1971 = vmatprep.subr.bf16.mxu0 %v2437_v0 }
 0x494   : > { %1972 = vmatpush3.bf16.msra.mxu0 %v2148_v13 }
 0x562   : > { %v1367_v15 = vpop.f32.mrb[16].mxu0 }
 0x563   : > { %v1381_v17 = vmul.f32 %v1848_v14, %v1367_v15  ;;  %v1967_v18 = vpop.f32.mrb[17].mxu0 }
 0x564   : > { %v1370_v19 = vpop.f32.mrb[18].mxu0 }
 0x565   : > { %v1390_v20 = vadd.f32 %v1850_v16, %v1381_v17  ;;  %v1968_v21 = vpop.f32.mrb[19].mxu0 }
 0x567   : > { %v1391_v0 = vadd.f32 %v1390_v20, %v1231_v61 }
 0x569   : > { %v1392_v22 = vpack.c.bf16 %v1391_v0, %v1391_v0 }
 0x56b   : > { %1974 = vmatmul.mubr.msk.bf16.vlgmr.msra.gmra.mrb[20].mxu0 %vm1094_vm2, %v1392_v22 }
 0x63e   : > { %v1453_v25 = vpop.f32.mrb[20].mxu0 }
 0x63f   : > { %v1454_v26 = vadd.f32 %v1851_v24, %v1453_v25  ;;  %v1975_v27 = vpop.f32.mrb[21].mxu0 }
 0x640   : > { %v1456_v28 = vpop.f32.mrb[22].mxu0 }
 0x641   : > { %v1976_v30 = vpop.f32.mrb[23].mxu0  ;;  %1977 = vmatprep.subr.mxu1 %v1454_v26 }
 0x642   : > { %1978 = vmatpush3.msra.mxu1 %v1454_v26 }
 0x643   : > { %1980 = vmatmul.mubr.msk.f32.vlgmr.msra.gmra.mrb[4].mxu1 %vm1461_vm4, %v1460_v29 }
 0x716   : > { %v1981_v31 = vpop.f32.mrb[4].mxu1 }
 0x717   : > { %v1867_v32 = vpack.c.bf16 %v1981_v31, %v1981_v31  ;;  %v1534_v33 = vpop.f32.mrb[5].mxu1 }
 0x718   : > { %v1866_v34 = vpack.c.bf16 %v1534_v33, %v1534_v33 }
 0x719   : > { %1552 = vst.msk [vmem:[%s679_s2 + $0x4] sm:$0xf] %vm778_vm3, %v1867_v32 }
 0x71a   : > { %1551 = vst.msk [vmem:[%s679_s2] sm:$0xf] %vm778_vm3, %v1866_v34 }
 0x71b PF: > { %s42_s29 = sadd.s32 1, %s2421_s29   ;;  %s3012_s4 = smov %s2397_s24 }
 0x71c   : > { %p39_p11 = scmp.ge.s32.totalorder %s42_s29, 6   ;;  %s3013_s24 = smov %s2401_s25 }
 0x71d   : > { %s3014_s25 = smov %s2725_s21  ;;  %s3015_s26 = smov %s2413_s28 }
 0x71e   : > { %s3016_s27 = smov %s2417_s1  ;;  %s3017_s28 = smov %s3020_s7 }
 0x71f   : > { %s3018_s1 = smov %s3024_s22  ;;  %41 = sbr.rel (!%p39_p11) target bundleno = 39 (0x27), region = 166 }
 0x726   :  { %1608 = vsyncpa [#allocation6], 1 }
 0x727   :  { %1610 = vsyncpa [#allocation6 + $0x1], 1 }
 0x728   :  { %1611 = vsyncpa [#allocation8], 1 }
 0x729   :  { %1612 = vsyncpa [#allocation11], 1 }
 0x72a   :  { %1613 = vsyncpa [#allocation14], 1 }

</bundles_post_ra>
